<compile_context>
chip_gen: v7x
topology: tpu7x:2x2x1
jax: 0.10.0
libtpu: 0.0.40
codegen_flags: <defaults>
</compile_context>

<pallas_src>
import jax
import jax.numpy as jnp
from jax.experimental import pallas as pl
from jax.experimental.pallas import tpu as pltpu

DIM = 128          # hidden dim of both MLPs (fixed to 128 in the module)
NEG_BIG = -9.0e15  # masked_fill value from the PyTorch code


def _deepmil_kernel(x_ref, w1_ref, b1_ref, w2_ref, b2_ref,
                    w3_ref, b3_ref, w4_ref, b4_ref,
                    a_ref, out_ref):
    bt, k, c = x_ref.shape
    x = x_ref[...]                                            # (bt, K, C)

    # ---- attention MLP, batched over every patch of every bag in the block --
    x2 = x.reshape(bt * k, c)                                 # pure relayout (K % 8 == 0)
    h = jnp.dot(x2, w1_ref[...], preferred_element_type=jnp.float32) + b1_ref[...]
    h = jnp.tanh(h)                                           # (bt*K, 128)

    # Linear(128 -> 1): VPU multiply against the (1, 128) w2 row + lane reduce
    # (avoids feeding the MXU an N=1 matmul).
    logits = jnp.sum(h * w2_ref[...], axis=-1, keepdims=True) + b2_ref[...]
    logits = logits.reshape(bt, k, 1)                         # K is 8-aligned

    # ---- mask patches that are exactly all-zero ------------------------------
    mask = jnp.all(x == 0, axis=-1, keepdims=True)            # (bt, K, 1)
    logits = jnp.where(mask, jnp.float32(NEG_BIG), logits)

    # ---- softmax over K (patch axis) per bag ---------------------------------
    l_max = jnp.max(logits, axis=1, keepdims=True)            # (bt, 1, 1)
    e = jnp.exp(logits - l_max)                               # (bt, K, 1)
    denom = jnp.sum(e, axis=1, keepdims=True)                 # (bt, 1, 1)
    attn = e * pl.reciprocal(denom, approx=False)             # (bt, K, 1)

    # ---- weighted mean  M[b, c] = sum_k attn[b, k] * x[b, k, c] --------------
    m = jnp.sum(attn * x, axis=1)                             # (bt, C)

    # ---- classifier MLP: Linear(C->128) -> ReLU -> Linear(128->num_classes) --
    c1 = jnp.dot(m, w3_ref[...], preferred_element_type=jnp.float32) + b3_ref[...]
    c1 = jnp.maximum(c1, 0.0)                                 # (bt, 128)
    out = jnp.dot(c1, w4_ref[...], preferred_element_type=jnp.float32) + b4_ref[...]

    # Lane-dense store of A: (bt, K, 1) -> (bt, 1, K) is logically the same
    # linear order (the swapped dim has size 1); Mosaic relayouts K onto lanes.
    a_ref[...] = attn.reshape(bt, 1, k)                       # (bt, 1, K)
    out_ref[...] = out.reshape(bt, 1, out.shape[-1])          # (bt, 1, num_classes)


def _pick_block_b(B, K_pad, C):
    """Bags per grid step.  Sized purely by a per-generation-safe VMEM budget
    (the x tile is double-buffered by the pipeline and the attn*x temporary is
    roughly one more tile), and capped so there are >= 2 grid steps whenever
    B >= 2 (gives v7x's two TensorCores independent parallel work)."""
    bytes_per_bag = 4 * K_pad * C
    x_tile_budget = 6 * 1024 * 1024            # per pipeline buffer
    bt = max(1, x_tile_budget // max(bytes_per_bag, 1))
    if B >= 2:
        bt = min(bt, pl.cdiv(B, 2))            # guarantee >= 2 grid steps
    return max(1, min(bt, B))


def deepmil_attention(x, params, *, block_b=None):
    """x: (B, K, C) float32.  Returns (A, out) = ((B, K, 1), (B, num_classes))."""
    B, K, C = x.shape
    w1, b1, w2, b2, w3, b3, w4, b4 = params
    num_classes = w4.shape[1]

    # Pad K to a multiple of 8: padded patches are all-zero -> masked ->
    # exp underflows to exactly 0 -> real attention weights / pooled mean are
    # unchanged; padded columns are sliced off below.
    k_pad = pl.cdiv(K, 8) * 8
    if k_pad != K:
        x = jnp.pad(x, ((0, 0), (0, k_pad - K), (0, 0)))

    bt = block_b if block_b is not None else _pick_block_b(B, k_pad, C)
    b_pad = pl.cdiv(B, bt) * bt
    if b_pad != B:
        # Padded bags are all-zero -> fully masked -> uniform attention (no
        # NaN); they are sliced off below and never touch real outputs.
        x = jnp.pad(x, ((0, b_pad - B), (0, 0), (0, 0)))

    w2_row = w2.reshape(1, DIM)                # lane-friendly row for the VPU reduce

    # Explicit scoped-VMEM request derived from the actual footprint:
    # 2x x tile (double-buffered) + ~2x for in-kernel temporaries + weights,
    # capped well under v7x's 64 MiB physical VMEM (v5e/v6e have 128 MiB).
    x_tile_bytes = 4 * bt * k_pad * C
    est = 4 * x_tile_bytes + 4 * C * DIM * 4 + (4 << 20)
    vmem_limit = int(min(48 << 20, max(32 << 20, est)))

    full2d = lambda b: (0, 0)

    attn, out = pl.pallas_call(
        _deepmil_kernel,
        out_shape=(
            jax.ShapeDtypeStruct((b_pad, 1, k_pad), jnp.float32),        # A, lane-dense
            jax.ShapeDtypeStruct((b_pad, 1, num_classes), jnp.float32),  # logits
        ),
        grid_spec=pltpu.PrefetchScalarGridSpec(
            num_scalar_prefetch=0,
            grid=(b_pad // bt,),
            in_specs=[
                pl.BlockSpec((bt, k_pad, C), lambda b: (b, 0, 0)),       # x (bt bags/step)
                pl.BlockSpec((C, DIM), full2d),                          # w1
                pl.BlockSpec((1, DIM), full2d),                          # b1
                pl.BlockSpec((1, DIM), full2d),                          # w2 as a row
                pl.BlockSpec((1, 1), full2d),                            # b2
                pl.BlockSpec((C, DIM), full2d),                          # w3
                pl.BlockSpec((1, DIM), full2d),                          # b3
                pl.BlockSpec((DIM, num_classes), full2d),                # w4
                pl.BlockSpec((1, num_classes), full2d),                  # b4
            ],
            out_specs=[
                pl.BlockSpec((bt, 1, k_pad), lambda b: (b, 0, 0)),       # A
                pl.BlockSpec((bt, 1, num_classes), lambda b: (b, 0, 0)), # out
            ],
        ),
        compiler_params=pltpu.CompilerParams(
            # Independent bag blocks -> megacore-shardable across v7x's 2 TCs.
            dimension_semantics=("parallel",),
            vmem_limit_bytes=vmem_limit,
        ),
    )(x, w1, b1, w2_row, b2, w3, b3, w4, b4)

    # TODO(synk): for production bag sizes (K in the thousands) add a trailing
    # "arbitrary" K-tile grid axis with an online softmax + VMEM accumulators so
    # VMEM use is decoupled from K; unnecessary at these shapes.

    attn = attn[:B, 0, :K][..., None]          # back to module layout (B, K, 1)
    out = out[:B, 0, :]                        # (B, num_classes)
    return attn, out


def init_params(key, in_dim, num_classes):
    """Deterministic PyTorch-style uniform(-1/sqrt(fan_in), 1/sqrt(fan_in)) init."""
    def lin(k, fan_in, fan_out):
        kw, kb = jax.random.split(k)
        bound = 1.0 / jnp.sqrt(fan_in)
        w = jax.random.uniform(kw, (fan_in, fan_out), jnp.float32, -bound, bound)
        b = jax.random.uniform(kb, (1, fan_out), jnp.float32, -bound, bound)
        return w, b

    k1, k2, k3, k4 = jax.random.split(key, 4)
    w1, b1 = lin(k1, in_dim, DIM)      # attention[0]
    w2, b2 = lin(k2, DIM, 1)           # attention[2]
    w3, b3 = lin(k3, in_dim, DIM)      # classifier[0]
    w4, b4 = lin(k4, DIM, num_classes) # classifier[2]
    return (w1, b1, w2, b2, w3, b3, w4, b4)


def reference(x, params):
    """Pure-JAX reference of DeepMIL.forward for validation."""
    w1, b1, w2, b2, w3, b3, w4, b4 = params
    a = jnp.tanh(x @ w1 + b1) @ w2 + b2                        # (B, K, 1)
    mask = jnp.all(x == 0, axis=2)[..., None]                  # (B, K, 1)
    a = jnp.where(mask, NEG_BIG, a)
    a = jax.nn.softmax(a, axis=1)
    m = jnp.einsum('bkd,bko->bo', a, x)                        # (B, C)
    out = jnp.maximum(m @ w3 + b3, 0.0) @ w4 + b4              # (B, num_classes)
    return a, out


if __name__ == "__main__":
    # cfg = {'model': 'DeepMIL', 'backbone': 'alexnet', 'num_classes': 4}
    # K=10 deliberately exercises the K-padding (pad to 16) and slicing path.
    B, K, C, NUM_CLASSES = 2, 10, 256, 4   # out_channel['alexnet'] == 256

    key = jax.random.PRNGKey(0)
    kx, kp = jax.random.split(key)
    x = jax.random.normal(kx, (B, K, C), jnp.float32)
    # Zero out a couple of patches to exercise the masked_fill path.
    x = x.at[0, K - 1, :].set(0.0)
    x = x.at[1, K - 2:, :].set(0.0)

    params = init_params(kp, C, NUM_CLASSES)

    attn, out = deepmil_attention(x, params)
    jax.block_until_ready((attn, out))

    attn_ref, out_ref = reference(x, params)
    assert attn.shape == (B, K, 1) and out.shape == (B, NUM_CLASSES)
    # Tolerances account for f32 reduce-order differences (VPU/XLU reduces vs
    # XLA matmuls in the reference); still tight enough to catch real bugs.
    assert jnp.allclose(attn, attn_ref, atol=1e-4, rtol=1e-4)
    assert jnp.allclose(out, out_ref, atol=1e-3, rtol=1e-3)

    print("KERNEL_OK")
</pallas_src>

<mosaic_0001>
module attributes {stable_mosaic.version = 11 : i64} {
  func.func @_deepmil_kernel(%arg0: i32, %arg1: memref<1x16x256xf32, #tpu.memory_space<vmem>>, %arg2: memref<256x128xf32, #tpu.memory_space<vmem>>, %arg3: memref<1x128xf32, #tpu.memory_space<vmem>>, %arg4: memref<1x128xf32, #tpu.memory_space<vmem>>, %arg5: memref<1x1xf32, #tpu.memory_space<vmem>>, %arg6: memref<256x128xf32, #tpu.memory_space<vmem>>, %arg7: memref<1x128xf32, #tpu.memory_space<vmem>>, %arg8: memref<128x4xf32, #tpu.memory_space<vmem>>, %arg9: memref<1x4xf32, #tpu.memory_space<vmem>>, %arg10: memref<1x1x16xf32, #tpu.memory_space<vmem>>, %arg11: memref<1x1x4xf32, #tpu.memory_space<vmem>>) attributes {dimension_semantics = [#tpu.dimension_semantics<parallel>], iteration_bounds = array<i64: 2>, scalar_prefetch = 0 : i64, scratch_operands = 0 : i64, tpu.core_type = #tpu.core_type<tc>, window_params = [{transform_indices = @transform_0, window_bounds = array<i64: 1, 16, 256>}, {pipeline_mode = #tpu.pipeline_mode<synchronous>, transform_indices = @transform_1, window_bounds = array<i64: 256, 128>}, {pipeline_mode = #tpu.pipeline_mode<synchronous>, transform_indices = @transform_2, window_bounds = array<i64: 1, 128>}, {pipeline_mode = #tpu.pipeline_mode<synchronous>, transform_indices = @transform_3, window_bounds = array<i64: 1, 128>}, {pipeline_mode = #tpu.pipeline_mode<synchronous>, transform_indices = @transform_4, window_bounds = array<i64: 1, 1>}, {pipeline_mode = #tpu.pipeline_mode<synchronous>, transform_indices = @transform_5, window_bounds = array<i64: 256, 128>}, {pipeline_mode = #tpu.pipeline_mode<synchronous>, transform_indices = @transform_6, window_bounds = array<i64: 1, 128>}, {pipeline_mode = #tpu.pipeline_mode<synchronous>, transform_indices = @transform_7, window_bounds = array<i64: 128, 4>}, {pipeline_mode = #tpu.pipeline_mode<synchronous>, transform_indices = @transform_8, window_bounds = array<i64: 1, 4>}, {transform_indices = @transform_9, window_bounds = array<i64: 1, 1, 16>}, {transform_indices = @transform_10, window_bounds = array<i64: 1, 1, 4>}]} {
    %c0 = arith.constant 0 : index
    %c0_0 = arith.constant 0 : index
    %c0_1 = arith.constant 0 : index
    %0 = vector.load %arg1[%c0, %c0_0, %c0_1] : memref<1x16x256xf32, #tpu.memory_space<vmem>>, vector<1x16x256xf32>
    %1 = vector.shape_cast %0 : vector<1x16x256xf32> to vector<16x256xf32>
    %c0_2 = arith.constant 0 : index
    %c0_3 = arith.constant 0 : index
    %2 = vector.load %arg2[%c0_2, %c0_3] : memref<256x128xf32, #tpu.memory_space<vmem>>, vector<256x128xf32>
    %cst = arith.constant dense<0.000000e+00> : vector<16x128xf32>
    %3 = tpu.matmul %1, %2, %cst {dimension_numbers = #tpu.dot_dimension_numbers<[1], [0], [0], [1], [0, 0, 1, 1], [], []>} : vector<16x256xf32>, vector<256x128xf32>, vector<16x128xf32> -> vector<16x128xf32>
    %c0_4 = arith.constant 0 : index
    %c0_5 = arith.constant 0 : index
    %4 = vector.load %arg3[%c0_4, %c0_5] : memref<1x128xf32, #tpu.memory_space<vmem>>, vector<1x128xf32>
    %5 = vector.broadcast %4 : vector<1x128xf32> to vector<16x128xf32>
    %6 = arith.addf %3, %5 : vector<16x128xf32>
    %7 = math.tanh %6 : vector<16x128xf32>
    %c0_6 = arith.constant 0 : index
    %c0_7 = arith.constant 0 : index
    %8 = vector.load %arg4[%c0_6, %c0_7] : memref<1x128xf32, #tpu.memory_space<vmem>>, vector<1x128xf32>
    %9 = vector.broadcast %8 : vector<1x128xf32> to vector<16x128xf32>
    %10 = arith.mulf %7, %9 : vector<16x128xf32>
    %cst_8 = arith.constant dense<0.000000e+00> : vector<16xf32>
    %11 = vector.multi_reduction <add>, %10, %cst_8 [1] : vector<16x128xf32> to vector<16xf32>
    %12 = vector.shape_cast %11 : vector<16xf32> to vector<16x1xf32>
    %c0_9 = arith.constant 0 : index
    %c0_10 = arith.constant 0 : index
    %13 = vector.load %arg5[%c0_9, %c0_10] : memref<1x1xf32, #tpu.memory_space<vmem>>, vector<1x1xf32>
    %14 = vector.broadcast %13 : vector<1x1xf32> to vector<16x1xf32>
    %15 = arith.addf %12, %14 : vector<16x1xf32>
    %16 = vector.shape_cast %15 : vector<16x1xf32> to vector<1x16x1xf32>
    %cst_11 = arith.constant 0.000000e+00 : f32
    %17 = vector.broadcast %cst_11 : f32 to vector<1x16x256xf32>
    %18 = arith.cmpf oeq, %0, %17 : vector<1x16x256xf32>
    %cst_12 = arith.constant 1.000000e+00 : f32
    %cst_13 = arith.constant 0.000000e+00 : f32
    %19 = vector.broadcast %cst_12 : f32 to vector<1x16x256xf32>
    %20 = vector.broadcast %cst_13 : f32 to vector<1x16x256xf32>
    %21 = arith.select %18, %19, %20 : vector<1x16x256xi1>, vector<1x16x256xf32>
    %cst_14 = arith.constant dense<0x7F800000> : vector<1x16xf32>
    %22 = vector.multi_reduction <minimumf>, %21, %cst_14 [2] : vector<1x16x256xf32> to vector<1x16xf32>
    %cst_15 = arith.constant 0.000000e+00 : f32
    %23 = vector.broadcast %cst_15 : f32 to vector<1x16xf32>
    %24 = arith.cmpf ogt, %22, %23 : vector<1x16xf32>
    %25 = vector.shape_cast %24 : vector<1x16xi1> to vector<1x16x1xi1>
    %cst_16 = arith.constant -9.000000e+15 : f32
    %26 = vector.broadcast %cst_16 : f32 to vector<1x16x1xf32>
    %27 = arith.select %25, %26, %16 : vector<1x16x1xi1>, vector<1x16x1xf32>
    %cst_17 = arith.constant dense<0xFF800000> : vector<1x1xf32>
    %28 = vector.multi_reduction <maximumf>, %27, %cst_17 [1] : vector<1x16x1xf32> to vector<1x1xf32>
    %29 = vector.shape_cast %28 : vector<1x1xf32> to vector<1x1x1xf32>
    %30 = vector.broadcast %29 : vector<1x1x1xf32> to vector<1x16x1xf32>
    %31 = arith.subf %27, %30 : vector<1x16x1xf32>
    %32 = math.exp %31 : vector<1x16x1xf32>
    %cst_18 = arith.constant dense<0.000000e+00> : vector<1x1xf32>
    %33 = vector.multi_reduction <add>, %32, %cst_18 [1] : vector<1x16x1xf32> to vector<1x1xf32>
    %34 = vector.shape_cast %33 : vector<1x1xf32> to vector<1x1x1xf32>
    %35 = tpu.reciprocal %34 : vector<1x1x1xf32> -> vector<1x1x1xf32>
    %36 = vector.broadcast %35 : vector<1x1x1xf32> to vector<1x16x1xf32>
    %37 = arith.mulf %32, %36 : vector<1x16x1xf32>
    %38 = vector.broadcast %37 : vector<1x16x1xf32> to vector<1x16x256xf32>
    %39 = arith.mulf %38, %0 : vector<1x16x256xf32>
    %cst_19 = arith.constant dense<0.000000e+00> : vector<1x256xf32>
    %40 = vector.multi_reduction <add>, %39, %cst_19 [1] : vector<1x16x256xf32> to vector<1x256xf32>
    %c0_20 = arith.constant 0 : index
    %c0_21 = arith.constant 0 : index
    %41 = vector.load %arg6[%c0_20, %c0_21] : memref<256x128xf32, #tpu.memory_space<vmem>>, vector<256x128xf32>
    %cst_22 = arith.constant dense<0.000000e+00> : vector<1x128xf32>
    %42 = tpu.matmul %40, %41, %cst_22 {dimension_numbers = #tpu.dot_dimension_numbers<[1], [0], [0], [1], [0, 0, 1, 1], [], []>} : vector<1x256xf32>, vector<256x128xf32>, vector<1x128xf32> -> vector<1x128xf32>
    %c0_23 = arith.constant 0 : index
    %c0_24 = arith.constant 0 : index
    %43 = vector.load %arg7[%c0_23, %c0_24] : memref<1x128xf32, #tpu.memory_space<vmem>>, vector<1x128xf32>
    %44 = arith.addf %42, %43 : vector<1x128xf32>
    %cst_25 = arith.constant 0.000000e+00 : f32
    %45 = vector.broadcast %cst_25 : f32 to vector<1x128xf32>
    %46 = arith.maximumf %44, %45 : vector<1x128xf32>
    %c0_26 = arith.constant 0 : index
    %c0_27 = arith.constant 0 : index
    %47 = vector.load %arg8[%c0_26, %c0_27] : memref<128x4xf32, #tpu.memory_space<vmem>>, vector<128x4xf32>
    %cst_28 = arith.constant dense<0.000000e+00> : vector<1x4xf32>
    %48 = tpu.matmul %46, %47, %cst_28 {dimension_numbers = #tpu.dot_dimension_numbers<[1], [0], [0], [1], [0, 0, 1, 1], [], []>} : vector<1x128xf32>, vector<128x4xf32>, vector<1x4xf32> -> vector<1x4xf32>
    %c0_29 = arith.constant 0 : index
    %c0_30 = arith.constant 0 : index
    %49 = vector.load %arg9[%c0_29, %c0_30] : memref<1x4xf32, #tpu.memory_space<vmem>>, vector<1x4xf32>
    %50 = arith.addf %48, %49 : vector<1x4xf32>
    %51 = vector.shape_cast %37 : vector<1x16x1xf32> to vector<1x1x16xf32>
    %c0_31 = arith.constant 0 : index
    %c0_32 = arith.constant 0 : index
    %c0_33 = arith.constant 0 : index
    %52 = vector.load %arg10[%c0_31, %c0_32, %c0_33] : memref<1x1x16xf32, #tpu.memory_space<vmem>>, vector<1x1x16xf32>
    tpu.vector_store %arg10[%c0_31, %c0_32, %c0_33], %51 {strides = array<i32>} : memref<1x1x16xf32, #tpu.memory_space<vmem>>, vector<1x1x16xf32>,
    %53 = vector.shape_cast %50 : vector<1x4xf32> to vector<1x1x4xf32>
    %c0_34 = arith.constant 0 : index
    %c0_35 = arith.constant 0 : index
    %c0_36 = arith.constant 0 : index
    %54 = vector.load %arg11[%c0_34, %c0_35, %c0_36] : memref<1x1x4xf32, #tpu.memory_space<vmem>>, vector<1x1x4xf32>
    tpu.vector_store %arg11[%c0_34, %c0_35, %c0_36], %53 {strides = array<i32>} : memref<1x1x4xf32, #tpu.memory_space<vmem>>, vector<1x1x4xf32>,
    return
  }
  func.func @transform_0(%arg0: i32) -> (i32, i32, i32) {
    %c0_i32 = arith.constant 0 : i32
    %c0_i32_0 = arith.constant 0 : i32
    %c0_i32_1 = arith.constant 0 : i32
    return %arg0, %c0_i32, %c0_i32_0 : i32, i32, i32
  }
  func.func @transform_1(%arg0: i32) -> (i32, i32) {
    %c0_i32 = arith.constant 0 : i32
    %c0_i32_0 = arith.constant 0 : i32
    %c0_i32_1 = arith.constant 0 : i32
    return %c0_i32, %c0_i32_0 : i32, i32
  }
  func.func @transform_2(%arg0: i32) -> (i32, i32) {
    %c0_i32 = arith.constant 0 : i32
    %c0_i32_0 = arith.constant 0 : i32
    %c0_i32_1 = arith.constant 0 : i32
    return %c0_i32, %c0_i32_0 : i32, i32
  }
  func.func @transform_3(%arg0: i32) -> (i32, i32) {
    %c0_i32 = arith.constant 0 : i32
    %c0_i32_0 = arith.constant 0 : i32
    %c0_i32_1 = arith.constant 0 : i32
    return %c0_i32, %c0_i32_0 : i32, i32
  }
  func.func @transform_4(%arg0: i32) -> (i32, i32) {
    %c0_i32 = arith.constant 0 : i32
    %c0_i32_0 = arith.constant 0 : i32
    %c0_i32_1 = arith.constant 0 : i32
    return %c0_i32, %c0_i32_0 : i32, i32
  }
  func.func @transform_5(%arg0: i32) -> (i32, i32) {
    %c0_i32 = arith.constant 0 : i32
    %c0_i32_0 = arith.constant 0 : i32
    %c0_i32_1 = arith.constant 0 : i32
    return %c0_i32, %c0_i32_0 : i32, i32
  }
  func.func @transform_6(%arg0: i32) -> (i32, i32) {
    %c0_i32 = arith.constant 0 : i32
    %c0_i32_0 = arith.constant 0 : i32
    %c0_i32_1 = arith.constant 0 : i32
    return %c0_i32, %c0_i32_0 : i32, i32
  }
  func.func @transform_7(%arg0: i32) -> (i32, i32) {
    %c0_i32 = arith.constant 0 : i32
    %c0_i32_0 = arith.constant 0 : i32
    %c0_i32_1 = arith.constant 0 : i32
    return %c0_i32, %c0_i32_0 : i32, i32
  }
  func.func @transform_8(%arg0: i32) -> (i32, i32) {
    %c0_i32 = arith.constant 0 : i32
    %c0_i32_0 = arith.constant 0 : i32
    %c0_i32_1 = arith.constant 0 : i32
    return %c0_i32, %c0_i32_0 : i32, i32
  }
  func.func @transform_9(%arg0: i32) -> (i32, i32, i32) {
    %c0_i32 = arith.constant 0 : i32
    %c0_i32_0 = arith.constant 0 : i32
    %c0_i32_1 = arith.constant 0 : i32
    return %arg0, %c0_i32, %c0_i32_0 : i32, i32, i32
  }
  func.func @transform_10(%arg0: i32) -> (i32, i32, i32) {
    %c0_i32 = arith.constant 0 : i32
    %c0_i32_0 = arith.constant 0 : i32
    %c0_i32_1 = arith.constant 0 : i32
    return %arg0, %c0_i32, %c0_i32_0 : i32, i32, i32
  }
}

</mosaic_0001>

<bundles_post_ra>
// kernel: tpu_custom_call.1
= control target key start
LH: loop header
LB: loop body
LE: loop exit
PB: predicated region body
PF: predicated region fallthrough
CT: control target
= control target key end

     0   :  { %s1812_s0 = inlined_call_operand.vmem [shape: f32[2,16,256], index: 0, kind: input, shape index: {}]   ;;  %s1813_s1 = inlined_call_operand.hbm [shape: f32[256,128], index: 1, kind: input, shape index: {}]   ;;  %s1814_s2 = inlined_call_operand.vmem [shape: f32[1,128], index: 2, kind: input, shape index: {}]   ;;  %s1815_s3 = inlined_call_operand.vmem [shape: f32[1,128], index: 3, kind: input, shape index: {}]   ;;  %s1816_s4 = inlined_call_operand.<no memory space> [shape: f32[1,1], index: 4, kind: input, shape index: {}]   ;;  %s1817_s5 = inlined_call_operand.hbm [shape: f32[256,128], index: 5, kind: input, shape index: {}]   ;;  %s1818_s6 = inlined_call_operand.vmem [shape: f32[1,128], index: 6, kind: input, shape index: {}]   ;;  %s1819_s7 = inlined_call_operand.vmem [shape: f32[128,4], index: 7, kind: input, shape index: {}]   ;;  %s1820_s8 = inlined_call_operand.vmem [shape: f32[1,4], index: 8, kind: input, shape index: {}]   ;;  %s1821_s9 = inlined_call_operand.hbm [shape: f32[2,1,16], index: 9, kind: output, shape index: {0}]   ;;  %s1822_s10 = inlined_call_operand.hbm [shape: f32[2,1,4], index: 10, kind: output, shape index: {1}]  }
   0x1   :  { %v16_v0 = vstv %s1816_s4 }
   0x2   :  { %17 = vst [vmem:[#allocation2] sm:$0x1] %v16_v0 }
   0x3   :  { %18 = vsyncpa [#allocation4], 0 }
   0x4   :  { %19 = vsyncpa [#allocation7], 0 }
   0x5   :  { %20 = vsyncpa [#allocation5], 0 }
   0x6   :  { %22 = vsyncpa [#allocation5 + $0x1], 0 }
   0x7   :  { %23 = vsyncpa [#allocation10], 0 }
   0x8   :  { %25 = vsyncpa [#allocation10 + $0x1], 0  ;;  %s1501_s15 = smov 0   ;;  %s1503_s16 = smov 0  }
   0x9   :  { %s1505_s17 = smov 0   ;;  %s1507_s18 = smov 0  }
   0xa LB: > { %1829 = sst [smem:[#allocation15_spill]] %s1427_s17  ;;  %s1522_s4 = sadd.s32 4294967295, %s1431_s18   ;;  %s1431_s18 = sphi %s1507_s18, %s1843_s18   ;;  %s1427_s17 = sphi %s1505_s17, %s1845_s17   ;;  %s1423_s16 = sphi %s1503_s16, %s1847_s16   ;;  %s1419_s15 = sphi %s1501_s15, %s1846_s15  }
   0xb   : > { %s959_s19 = sadd.s32 4294967294, %s1431_s18   ;;  %s1526_s20 = sadd.s32 1, %s1431_s18  }
   0xc   : > { %1830 = sst [smem:[#allocation16_spill]] %s1526_s20  ;;  %s232_s21 = sadd.s32 1, %s1427_s17 }
   0xd   : > { %s229_s22 = ssub.s32 %s1431_s18, %s1526_s20  ;;  %p242_p0 = scmp.ne.s32.totalorder %s1427_s17, %s1423_s16 }
   0xe   : > { %p230_p1 = scmp.eq.s32.totalorder %s229_s22, 0  ;;  %p243_p2 = scmp.eq.s32.totalorder %s1522_s4, 1 }
   0xf   : > { %p248_p3 = scmp.ne.s32.totalorder %s1423_s16, %s1419_s15  ;;  %p249_p4 = scmp.eq.s32.totalorder %s959_s19, 1 }
  0x10   : > { %s1537_s23 = scalar_select %p230_p1, %s1427_s17, %s232_s21  }
  0x11   : > { %p1539_p5 = por %p243_p2, %p242_p0  ;;  %p1543_p6 = por %p249_p4, %p248_p3 }
  0x12   : > { %1831 = sst [smem:[#allocation17_spill]] %s1537_s23  ;;  %p960_p7 = scmp.ge.s32.totalorder %s1431_s18, 1 }
  0x13   : > { %s1832_s24 = scalar_select %p1539_p5, 1, 0 }
  0x14   : > { %s1833_s25 = scalar_select %p1543_p6, 1, 0 }
  0x15   : > { %p282_p8 = scmp.lt.s32.totalorder %s1431_s18, 3  ;;  %p1823_p9 = scmp.eq.s32.totalorder %s1522_s4, 0 }
  0x16   : > { %s1433_s27 = smov [#allocation3]   ;;  %s1434_s30 = smov [#allocation6]  }
  0x17   : > { %p1550_p10 = pnand %p960_p7, %p282_p8  ;;  %s294_s28 = sshll.u32 %s1433_s27, 4  ;;  %s295_s28 = int_to_ptr.vmem [resolvable:$true] %s294_s28 }
  0x18   : > { %s316_s11 = sshll.u32 %s1434_s30, 4  ;;  %s1273_s14 = scalar_lea.hbm %s1813_s1, 4096  ;;  %s1562_s11 = int_to_ptr.vmem [resolvable:$true] %s316_s11 }
  0x19   : > { %s1834_s26 = scalar_select %p1550_p10, 1, 0 }
  0x1a   : > { %p1202_p11 = pneg %p1550_p10  ;;  %p1274_p13 = scmp.ne.s32.totalorder %s1813_s1, %s1273_s14 }
  0x1b   : > { %p1280_p3 = scmp.lt.u32.totalorder %s1273_s14, %s1813_s1 }
  0x1c   : > { %p1558_p12 = pnand %p1823_p9, %p1202_p11 }
  0x1e   : > { %p1275_p0 = pneg %p1558_p12 }
  0x20   : > { %p1276_p1 = pnand %p1275_p0, %p1274_p13 }
  0x22   : > { %p1277_p2 = pneg %p1276_p1 }
  0x24   : > { %p1282_p4 = pnand %p1280_p3, %p1277_p2 }
  0x26   : > { %1285 = shalt.err (!%p1282_p4)
}
  0x27   : > { %s1286_s30 = scalar_lea.vmem %s295_s28, 4096  ;;  %p1294_p9 = scmp.lt.s32.totalorder %s295_s28, %s295_s28 }
  0x28   : > { %p1287_p7 = scmp.ne.s32.totalorder %s295_s28, %s1286_s30  ;;  %p1295_p6 = scmp.lt.s32.totalorder %s1286_s30, %s1286_s30 }
  0x2a   : > { %p1289_p8 = pnand %p1287_p7, %p1275_p0  ;;  %p1296_p5 = por %p1295_p6, %p1294_p9 }
  0x2c   : > { %p1290_p11 = pneg %p1289_p8 }
  0x2e   : > { %p1297_p10 = pnand %p1296_p5, %p1290_p11 }
  0x30   : > { %1300 = shalt.err (!%p1297_p10)
}
  0x31   : > { %s1435_s12 = smov 128   ;;  %s1436_s13 = smov 8  }
  0x32   : > { %1205 = dma.hbm_to_vmem [thread:$0]  (!%p1558_p12), %s1813_s1, 4096, %s295_s28, [#allocation4], %s1435_s12, %s1435_s12, %s1436_s13  }
  0x33   : > { %s1301_s27 = scalar_lea.hbm %s1817_s5, 4096 }
  0x34   : > { %p1302_p13 = scmp.ne.s32.totalorder %s1817_s5, %s1301_s27  ;;  %p1308_p9 = scmp.lt.u32.totalorder %s1301_s27, %s1817_s5 }
  0x36   : > { %p1304_p5 = pnand %p1302_p13, %p1275_p0 }
  0x38   : > { %p1305_p6 = pneg %p1304_p5 }
  0x3a   : > { %p1310_p10 = pnand %p1308_p9, %p1305_p6 }
  0x3c   : > { %1313 = shalt.err (!%p1310_p10)
}
  0x3d   : > { %s1314_s28 = scalar_lea.vmem %s1562_s11, 4096  ;;  %p1322_p4 = scmp.lt.s32.totalorder %s1562_s11, %s1562_s11 }
  0x3e   : > { %p1315_p1 = scmp.ne.s32.totalorder %s1562_s11, %s1314_s28  ;;  %p1323_p7 = scmp.lt.s32.totalorder %s1314_s28, %s1314_s28 }
  0x40   : > { %p1317_p2 = pnand %p1315_p1, %p1275_p0  ;;  %p1324_p8 = por %p1323_p7, %p1322_p4 }
  0x42   : > { %p1318_p3 = pneg %p1317_p2 }
  0x44   : > { %p1325_p11 = pnand %p1324_p8, %p1318_p3 }
  0x46   : > { %1328 = shalt.err (!%p1325_p11)
}
  0x47   : > { %1208 = dma.hbm_to_vmem [thread:$0]  (!%p1558_p12), %s1817_s5, 4096, %s1562_s11, [#allocation7], %s1435_s12, %s1435_s12, %s1436_s13  }
  0x48   : > { %p1836_p13 = scmp.ne.s32.totalorder %s1834_s26, 0 }
  0x49   : > { %p1837_p5 = scmp.eq.s32.totalorder (!%p1836_p13), %s1522_s4, 0 }
  0x4a   : > { %349 = sbr.rel (%p1836_p13) target bundleno = 1152 (0x480), region = 56 }
  0x51   : > { %1402 = dma.done.wait (%p1837_p5), [#allocation4], 4096   ;;  %p1838_p0 = pmov %p1837_p5 }
  0x53   : > { %1404 = vsyncadd (%p1838_p0), [#allocation4], 4294963200  ;;  %p1839_p6 = pmov %p1838_p0 }
  0x54   : > { %p1840_p9 = pmov %p1838_p0 }
  0x55   : > { %1406 = dma.done.wait (%p1839_p6), [#allocation7], 4096  }
  0x56   : > { %1408 = vsyncadd (%p1840_p9), [#allocation7], 4294963200  ;;  %p394_p10 = scmp.lt.s32.totalorder %s1522_s4, 1  ;;  %v419_v1 = vld [vmem:[#allocation3 + $0x80] sm:$0xff]  ;;  %v420_v2 = vld [vmem:[#allocation3 + $0x88] sm:$0xff]  ;;  %v1437_v53 = vmov 0.0  }
  0x57   : > { %v403_v3 = vld [vmem:[#allocation3] sm:$0xff]  ;;  %v1102_v4 = vpack.c.bf16 %v420_v2, %v419_v1  ;;  %v404_v5 = vld [vmem:[#allocation3 + $0x8] sm:$0xff]  ;;  %v421_v6 = vld [vmem:[#allocation3 + $0x90] sm:$0xff]  ;;  %vm559_vm6 = vcmask 7168   ;;  %s1706_s11 = sand.u32 1, %s1423_s16   ;;  %vm817_vm7 = vcmask 130112  }
  0x58   : > { %s395_s23 = scalar_select %p394_p10, %s1522_s4, 1  ;;  %v422_v7 = vld [vmem:[#allocation3 + $0x98] sm:$0xff]  ;;  %v1104_v8 = vpack.c.bf16 %v404_v5, %v403_v3  ;;  %v405_v10 = vld [vmem:[#allocation3 + $0x10] sm:$0xff]  ;;  %v423_v12 = vld [vmem:[#allocation3 + $0xa0] sm:$0xff]  ;;  %vm820_vm8 = vcmask 122880   ;;  %vm1440_vm9 = vmmov 0  }
  0x59   : > { %v1106_v9 = vpack.c.bf16 %v422_v7, %v421_v6  ;;  %v406_v11 = vld [vmem:[#allocation3 + $0x18] sm:$0xff]  ;;  %1103 = vmatprep.subr.bf16.mxu0 %v1102_v4  ;;  %v424_v13 = vld [vmem:[#allocation3 + $0xa8] sm:$0xff]  ;;  %v407_v16 = vld [vmem:[#allocation3 + $0x20] sm:$0xff]  ;;  %s825_s19 = scalar_lea.sflag [#allocation5], %s1706_s11  ;;  %p1841_p1 = scmp.ne.s32.totalorder %s1832_s24, 0 }
  0x5a   : > { %1105 = vmatpush3.bf16.msra.mxu0 %v1104_v8  ;;  %v1108_v14 = vpack.c.bf16 %v406_v11, %v405_v10  ;;  %s976_s26 = sshll.u32 %s395_s23, 5  ;;  %v1110_v15 = vpack.c.bf16 %v424_v13, %v423_v12  ;;  %v408_v17 = vld [vmem:[#allocation3 + $0x28] sm:$0xff]  ;;  %v425_v18 = vld [vmem:[#allocation3 + $0xb0] sm:$0xff]  ;;  %v426_v19 = vld [vmem:[#allocation3 + $0xb8] sm:$0xff]  ;;  %v1438_v10 = vmov 0   ;;  %s972_s23 = sshll.u32 %s1522_s4, 4 }
  0x5b   : > { %1107 = vmatprep.subr.bf16.mxu0 %v1106_v9  ;;  %s1626_s12 = scalar_lea.vmem %s1812_s0, %s976_s26  ;;  %v1112_v20 = vpack.c.bf16 %v408_v17, %v407_v16  ;;  %v1114_v21 = vpack.c.bf16 %v426_v19, %v425_v18  ;;  %v409_v22 = vld [vmem:[#allocation3 + $0x30] sm:$0xff]  ;;  %v410_v23 = vld [vmem:[#allocation3 + $0x38] sm:$0xff]  ;;  %v427_v24 = vld [vmem:[#allocation3 + $0xc0] sm:$0xff]  ;;  %1262 = vset.pattern.permute.xlu1 %v1438_v10  ;;  %s1738_s13 = scalar_lea.hbm %s1821_s9, %s972_s23 }
  0x5c   : > { %v428_v25 = vld [vmem:[#allocation3 + $0xc8] sm:$0xff]  ;;  %v1116_v27 = vpack.c.bf16 %v410_v23, %v409_v22  ;;  %v411_v29 = vld [vmem:[#allocation3 + $0x40] sm:$0xff]  ;;  %v429_v31 = vld [vmem:[#allocation3 + $0xd0] sm:$0xff]  ;;  %1261 = vset.pattern.permute.xlu0 %v1438_v10  ;;  %s1441_s22 = smov [#allocation8]  }
  0x5d   : > { %v1629_v26 = vld [vmem:[%s1626_s12 + $0x8] sm:$0xff]  ;;  %v1118_v28 = vpack.c.bf16 %v428_v25, %v427_v24  ;;  %v430_v32 = vld [vmem:[#allocation3 + $0xd8] sm:$0xff]  ;;  %v413_v35 = vld [vmem:[#allocation3 + $0x50] sm:$0xff]  ;;  %s1333_s27 = sshll.u32 %s1441_s22, 4  ;;  %s1334_s27 = int_to_ptr.vmem [resolvable:$false] %s1333_s27 }
  0x5e   : > { %1109 = vmatpush3.bf16.msra.mxu0 %v1108_v14  ;;  %506 = vmatprep.mubr.f32.mxu0 %v1629_v26  ;;  %v412_v30 = vld [vmem:[#allocation3 + $0x48] sm:$0xff]  ;;  %v1122_v34 = vpack.c.bf16 %v430_v32, %v429_v31  ;;  %v414_v36 = vld [vmem:[#allocation3 + $0x58] sm:$0xff]  ;;  %v431_v37 = vld [vmem:[#allocation3 + $0xe0] sm:$0xff]  ;;  %vm542_vm1 = vcmp.eq.f32.partialorder %v1629_v26, 0.0  ;;  %s1335_s30 = scalar_lea.vmem %s1334_s27, 32 }
  0x5f   : > { %1111 = vmatprep.subr.bf16.mxu0 %v1110_v15  ;;  %v1120_v33 = vpack.c.bf16 %v412_v30, %v411_v29  ;;  %v432_v38 = vld [vmem:[#allocation3 + $0xe8] sm:$0xff]  ;;  %v1124_v39 = vpack.c.bf16 %v414_v36, %v413_v35  ;;  %v415_v41 = vld [vmem:[#allocation3 + $0x60] sm:$0xff]  ;;  %v433_v43 = vld [vmem:[#allocation3 + $0xf0] sm:$0xff]  ;;  %v546_v55 = vsel %vm542_vm1, 1.0, %v1437_v53 }
  0x60   : > { %v1126_v40 = vpack.c.bf16 %v432_v38, %v431_v37  ;;  %v416_v42 = vld [vmem:[#allocation3 + $0x68] sm:$0xff]  ;;  %v434_v44 = vld [vmem:[#allocation3 + $0xf8] sm:$0xff]  ;;  %v417_v47 = vld [vmem:[#allocation3 + $0x70] sm:$0xff] }
  0x61   : > { %v1128_v45 = vpack.c.bf16 %v416_v42, %v415_v41  ;;  %v1130_v46 = vpack.c.bf16 %v434_v44, %v433_v43  ;;  %v418_v48 = vld [vmem:[#allocation3 + $0x78] sm:$0xff]  ;;  %v1641_v52 = vld [vmem:[%s1626_s12 + $0x10] sm:$0xff]  ;;  %v631_v11 = vld [vmem:[#allocation6 + $0x80] sm:$0xff] }
  0x62   : > { %1113 = vmatpush3.bf16.msra.mxu0 %v1112_v20  ;;  %v1132_v49 = vpack.c.bf16 %v418_v48, %v417_v47  ;;  %v1633_v50 = vld [vmem:[%s1626_s12] sm:$0xff]  ;;  %v1636_v51 = vld [vmem:[%s1626_s12 + $0x18] sm:$0xff]  ;;  %vm543_vm2 = vcmp.eq.f32.partialorder %v1641_v52, 0.0  ;;  %v632_v12 = vld [vmem:[#allocation6 + $0x88] sm:$0xff]  ;;  %s387_s12 = scalar_lea.vmem [#allocation8], %s1706_s11 }
  0x63   : > { %1115 = vmatprep.subr.bf16.mxu0 %v1114_v21  ;;  %vm541_vm0 = vcmp.eq.f32.partialorder %v1633_v50, 0.0  ;;  %vm544_vm3 = vcmp.eq.f32.partialorder %v1636_v51, 0.0  ;;  %v547_v57 = vsel %vm543_vm2, 1.0, %v1437_v53  ;;  %v969_v61 = vld [vmem:[%s1814_s2] ss:$0 sm:$0xff]  ;;  %v615_v13 = vld [vmem:[#allocation6] sm:$0xff]  ;;  %v1134_v14 = vpack.c.bf16 %v632_v12, %v631_v11 }
  0x64   : > { %v545_v54 = vsel %vm541_vm0, 1.0, %v1437_v53  ;;  %v548_v58 = vsel %vm544_vm3, 1.0, %v1437_v53  ;;  %v970_v5 = vld [vmem:[%s1815_s3] ss:$0 sm:$0xff]  ;;  %v616_v15 = vld [vmem:[#allocation6 + $0x8] sm:$0xff]  ;;  %v633_v16 = vld [vmem:[#allocation6 + $0x90] sm:$0xff] }
  0x65   : > { %v549_v56 = vmin.f32 %v545_v54, %v546_v55  ;;  %v552_v59 = vmin.f32 %v547_v57, %v548_v58  ;;  %v634_v17 = vld [vmem:[#allocation6 + $0x98] sm:$0xff]  ;;  %v1136_v18 = vpack.c.bf16 %v616_v15, %v615_v13  ;;  %v617_v20 = vld [vmem:[#allocation6 + $0x10] sm:$0xff]  ;;  %v635_v22 = vld [vmem:[#allocation6 + $0xa0] sm:$0xff]  ;;  %1135 = vmatprep.subr.bf16.mxu1 %v1134_v14  ;;  %s841_s14 = sshll.u32 %s387_s12, 4  ;;  %s842_s14 = int_to_ptr.vmem [resolvable:$true] %s841_s14 }
  0x66   : > { %1117 = vmatpush3.bf16.msra.mxu0 %v1116_v27  ;;  %v1138_v19 = vpack.c.bf16 %v634_v17, %v633_v16  ;;  %v618_v21 = vld [vmem:[#allocation6 + $0x18] sm:$0xff]  ;;  %v636_v23 = vld [vmem:[#allocation6 + $0xa8] sm:$0xff]  ;;  %v619_v27 = vld [vmem:[#allocation6 + $0x20] sm:$0xff]  ;;  %s1329_s21 = scalar_lea.vmem %s842_s14, 16  ;;  %p1336_p4 = scmp.lt.s32.totalorder %s842_s14, %s1334_s27 }
  0x67   : > { %1119 = vmatprep.subr.bf16.mxu0 %v1118_v28  ;;  %550 = vmin.xlane.f32.xlu1 %v549_v56  ;;  %v1140_v24 = vpack.c.bf16 %v618_v21, %v617_v20  ;;  %v1142_v25 = vpack.c.bf16 %v636_v23, %v635_v22  ;;  %v620_v28 = vld [vmem:[#allocation6 + $0x28] sm:$0xff]  ;;  %v637_v29 = vld [vmem:[#allocation6 + $0xb0] sm:$0xff]  ;;  %v638_v30 = vld [vmem:[#allocation6 + $0xb8] sm:$0xff]  ;;  %p1330_p12 = scmp.ne.s32.totalorder %s842_s14, %s1329_s21  ;;  %p1337_p7 = scmp.lt.s32.totalorder %s1335_s30, %s1329_s21 }
  0x68   : > { %1137 = vmatpush3.bf16.msra.mxu1 %v1136_v18  ;;  %v1144_v31 = vpack.c.bf16 %v620_v28, %v619_v27  ;;  %v1146_v32 = vpack.c.bf16 %v638_v30, %v637_v29  ;;  %v971_v37 = vld [vmem:[#allocation2] ss:$0 sm:$0xff]  ;;  %v639_v12 = vld [vmem:[#allocation6 + $0xc0] sm:$0xff]  ;;  %v640_v13 = vld [vmem:[#allocation6 + $0xc8] sm:$0xff] }
  0x69   : > { %1139 = vmatprep.subr.bf16.mxu1 %v1138_v19  ;;  %v1150_v14 = vpack.c.bf16 %v640_v13, %v639_v12  ;;  %v623_v15 = vld [vmem:[#allocation6 + $0x40] sm:$0xff]  ;;  %v624_v16 = vld [vmem:[#allocation6 + $0x48] sm:$0xff]  ;;  %v641_v18 = vld [vmem:[#allocation6 + $0xd0] sm:$0xff]  ;;  %p1331_p2 = pnand %p1330_p12, %p1841_p1  ;;  %p1338_p8 = por %p1337_p7, %p1336_p4 }
  0x6a   : > { %1121 = vmatpush3.bf16.msra.mxu0 %v1120_v33  ;;  %v621_v33 = vld [vmem:[#allocation6 + $0x30] sm:$0xff]  ;;  %v1152_v17 = vpack.c.bf16 %v624_v16, %v623_v15  ;;  %v642_v19 = vld [vmem:[#allocation6 + $0xd8] sm:$0xff]  ;;  %v627_v28 = vld [vmem:[#allocation6 + $0x60] sm:$0xff] }
  0x6b   : > { %1123 = vmatprep.subr.bf16.mxu0 %v1122_v34  ;;  %553 = vmin.xlane.f32.xlu1 %v552_v59  ;;  %v622_v34 = vld [vmem:[#allocation6 + $0x38] sm:$0xff]  ;;  %v1154_v20 = vpack.c.bf16 %v642_v19, %v641_v18  ;;  %v625_v21 = vld [vmem:[#allocation6 + $0x50] sm:$0xff]  ;;  %v628_v29 = vld [vmem:[#allocation6 + $0x68] sm:$0xff]  ;;  %p1332_p3 = pneg %p1331_p2 }
  0x6c   : > { %1141 = vmatpush3.bf16.msra.mxu1 %v1140_v24  ;;  %v1148_v35 = vpack.c.bf16 %v622_v34, %v621_v33  ;;  %v626_v22 = vld [vmem:[#allocation6 + $0x58] sm:$0xff]  ;;  %v643_v24 = vld [vmem:[#allocation6 + $0xe0] sm:$0xff]  ;;  %v645_v30 = vld [vmem:[#allocation6 + $0xf0] sm:$0xff] }
  0x6d   : > { %1143 = vmatprep.subr.bf16.mxu1 %v1142_v25  ;;  %v1156_v23 = vpack.c.bf16 %v626_v22, %v625_v21  ;;  %v644_v25 = vld [vmem:[#allocation6 + $0xe8] sm:$0xff]  ;;  %v629_v33 = vld [vmem:[#allocation6 + $0x70] sm:$0xff]  ;;  %v630_v34 = vld [vmem:[#allocation6 + $0x78] sm:$0xff]  ;;  %p1339_p11 = pnand %p1338_p8, %p1332_p3 }
  0x6e   : > { %1125 = vmatpush3.bf16.msra.mxu0 %v1124_v39  ;;  %v1158_v27 = vpack.c.bf16 %v644_v25, %v643_v24  ;;  %v731_v21 = vld [vmem:[%s1819_s7 + $0x60] sm:$0xff]  ;;  %v732_v22 = vld [vmem:[%s1819_s7 + $0x68] sm:$0xff]  ;;  %v733_v24 = vld [vmem:[%s1819_s7 + $0x70] sm:$0xff] }
  0x6f   : > { %1127 = vmatprep.subr.bf16.mxu0 %v1126_v40  ;;  %v734_v25 = vld [vmem:[%s1819_s7 + $0x78] sm:$0xff] }
  0x70   : > { %1145 = vmatpush3.bf16.msra.mxu1 %v1144_v31  ;;  %v1160_v31 = vpack.c.bf16 %v628_v29, %v627_v28  ;;  %v647_v29 = vld [vmem:[%s1818_s6] sm:$0x1] }
  0x71   : > { %1147 = vmatprep.subr.bf16.mxu1 %v1146_v32  ;;  %v646_v32 = vld [vmem:[#allocation6 + $0xf8] sm:$0xff] }
  0x72   : > { %1129 = vmatpush3.bf16.msra.mxu0 %v1128_v45 }
  0x73   : > { %1131 = vmatprep.subr.bf16.mxu0 %v1130_v46 }
  0x74   : > { %1149 = vmatpush3.bf16.msra.mxu1 %v1148_v35  ;;  %v1162_v35 = vpack.c.bf16 %v646_v32, %v645_v30 }
  0x75   : > { %1151 = vmatprep.subr.bf16.mxu1 %v1150_v14 }
  0x76   : > { %1133 = vmatpush3.bf16.msra.mxu0 %v1132_v49 }
  0x78   : > { %1153 = vmatpush3.bf16.msra.mxu1 %v1152_v17 }
  0x79   : > { %507 = vmatmul.mubr.f32.vlgmr.msra.gmra.mrb[0].mxu0 %v1633_v50  ;;  %1155 = vmatprep.subr.bf16.mxu1 %v1154_v20 }
  0x7a   : > { %511 = vmatprep.mubr.f32.mxu0 %v1636_v51 }
  0x7c   : > { %1157 = vmatpush3.bf16.msra.mxu1 %v1156_v23  ;;  %v1185_v23 = vpack.c.bf16 %v732_v22, %v731_v21 }
  0x7d   : > { %512 = vmatmul.mubr.f32.gmra.mrb[2].mxu0 %v1641_v52  ;;  %1159 = vmatprep.subr.bf16.mxu1 %v1158_v27  ;;  %v1188_v27 = vpack.c.bf16 %v734_v25, %v733_v24 }
  0x7e   : > { %1099 = vmatprep.mubr.msk.f32.mxu0 %vm1440_vm9, %v1437_v53 }
  0x80   : > { %1161 = vmatpush3.bf16.msra.mxu1 %v1160_v31 }
  0x81   : > { %1163 = vmatprep.subr.bf16.mxu1 %v1162_v35 }
  0xf4   : > { %v551_v36 = vpop.xlane.xlu1 %550 }
  0xf5   : > { %vm555_vm4 = vcmp.gt.f32.partialorder %v551_v36, 0.0  ;;  %v1164_v36 = vpack.c.bf16 %v630_v34, %v629_v33 }
  0xf7   : > { %1165 = vmatpush3.bf16.msra.mxu1 %v1164_v36 }
  0xf8   : > { %v554_v40 = vpop.xlane.xlu1 %553 }
  0xf9   : > { %vm556_vm5 = vcmp.gt.f32.partialorder %v554_v40, 0.0  ;;  %v1439_v40 = vmov 0.0|0.0  }
  0xfa   : > { %1166 = vmatprep.subr.bf16.mxu0 %v1439_v40 }
 0x14c   : > { %v1009_v60 = vpop.f32.mrb[0].mxu0 }
 0x14d   : > { %v1010_v62 = vpop.f32.mrb[1].mxu0 }
 0x14e   : > { %v1011_v63 = vadd.f32 %v1010_v62, %v1009_v60 }
 0x150   : > { %v509_v0 = vadd.f32 %v1011_v63, %v969_v61  ;;  %v1012_v1 = vpop.f32.mrb[2].mxu0 }
 0x151   : > { %v1013_v2 = vpop.f32.mrb[3].mxu0 }
 0x152   : > { %1263 = vtanh.f32 %v509_v0  ;;  %v1014_v3 = vadd.f32 %v1013_v2, %v1012_v1 }
 0x154   : > { %v514_v4 = vadd.f32 %v1014_v3, %v969_v61 }
 0x156   : > { %1265 = vtanh.f32 %v514_v4 }
 0x15c   : > { %v1264_v6 = vpop.eup %1263 }
 0x15d   : > { %v526_v7 = vmul.f32 %v1264_v6, %v970_v5 }
 0x15f   : > { %528 = vadd.xlane.f32.xlu0 %v526_v7 }
 0x160   : > { %v1266_v8 = vpop.eup %1265 }
 0x161   : > { %v527_v9 = vmul.f32 %v1266_v8, %v970_v5 }
 0x163   : > { %530 = vadd.xlane.f32.xlu0 %v527_v9 }
 0x1ec   : > { %v529_v38 = vpop.xlane.xlu0 %528 }
 0x1ed   : > { %v539_v39 = vadd.f32 %v971_v37, %v529_v38  ;;  %v720_v38 = vld [vmem:[%s1819_s7 + $0x8] sm:$0xff] }
 0x1ef   : > { %v557_v42 = vsel %vm555_vm4, -9e+15, %v539_v39  ;;  %v721_v39 = vld [vmem:[%s1819_s7 + $0x10] sm:$0xff] }
 0x1f0   : > { %v531_v41 = vpop.xlane.xlu0 %530  ;;  %v560_v45 = vsel %vm559_vm6, %v557_v42, -inf }
 0x1f1   : > { %v540_v43 = vadd.f32 %v971_v37, %v531_v41  ;;  %v719_v37 = vld [vmem:[%s1819_s7] sm:$0xff] }
 0x1f2   : > { %v1167_v41 = vpack.c.bf16 %v720_v38, %v719_v37 }
 0x1f3   : > { %v558_v44 = vsel %vm556_vm5, -9e+15, %v540_v43 }
 0x1f4   : > { %v561_v46 = vsel %vm559_vm6, %v558_v44, -inf  ;;  %1168 = vmatpush3.bf16.msra.mxu0 %v1167_v41 }
 0x1f5   : > { %v562_v47 = vmax.f32 %v560_v45, %v561_v46  ;;  %1169 = vmatprep.subr.bf16.mxu0 %v1439_v40  ;;  %v724_v45 = vld [vmem:[%s1819_s7 + $0x28] sm:$0xff] }
 0x1f7   : > { %v563_v48 = vrot.slane %v562_v47, 4 }
 0x1f9   : > { %v564_v49 = vmax.f32 %v562_v47, %v563_v48  ;;  %v725_v47 = vld [vmem:[%s1819_s7 + $0x30] sm:$0xff]  ;;  %v726_v48 = vld [vmem:[%s1819_s7 + $0x38] sm:$0xff] }
 0x1fb   : > { %v565_v54 = vrot.slane %v564_v49, 2 }
 0x1fd   : > { %v566_v55 = vmax.f32 %v564_v49, %v565_v54  ;;  %v1176_v49 = vpack.c.bf16 %v726_v48, %v725_v47  ;;  %v727_v54 = vld [vmem:[%s1819_s7 + $0x40] sm:$0xff] }
 0x1ff   : > { %v567_v56 = vrot.slane %v566_v55, 1 }
 0x201   : > { %v568_v57 = vmax.f32 %v566_v55, %v567_v56  ;;  %v728_v55 = vld [vmem:[%s1819_s7 + $0x48] sm:$0xff] }
 0x202   : > { %v1179_v56 = vpack.c.bf16 %v728_v55, %v727_v54 }
 0x203   : > { %v569_v58 = vsub.f32 %v557_v42, %v568_v57  ;;  %v570_v59 = vsub.f32 %v558_v44, %v568_v57  ;;  %v722_v42 = vld [vmem:[%s1819_s7 + $0x18] sm:$0xff]  ;;  %v723_v44 = vld [vmem:[%s1819_s7 + $0x20] sm:$0xff]  ;;  %v729_v57 = vld [vmem:[%s1819_s7 + $0x50] sm:$0xff] }
 0x204   : > { %v1170_v43 = vpack.c.bf16 %v722_v42, %v721_v39  ;;  %v1173_v46 = vpack.c.bf16 %v724_v45, %v723_v44 }
 0x205   : > { %v571_v60 = vmul.f32 1.442695, %v569_v58  ;;  %v573_v61 = vmul.f32 1.442695, %v570_v59  ;;  %v730_v58 = vld [vmem:[%s1819_s7 + $0x58] sm:$0xff] }
 0x206   : > { %1171 = vmatpush3.bf16.msra.mxu0 %v1170_v43  ;;  %v1182_v59 = vpack.c.bf16 %v730_v58, %v729_v57 }
 0x207   : > { %1267 = vpow2.f32 %v571_v60  ;;  %1172 = vmatprep.subr.bf16.mxu0 %v1439_v40  ;;  %v806_v60 = vlaneseq }
 0x208   : > { %1269 = vpow2.f32 %v573_v61 }
 0x209   : > { %v807_v61 = vand.u32 127, %v806_v60 }
 0x20a   : > { %1174 = vmatpush3.bf16.msra.mxu0 %v1173_v46 }
 0x20b   : > { %1175 = vmatprep.subr.bf16.mxu0 %v1439_v40 }
 0x20e   : > { %1177 = vmatpush3.bf16.msra.mxu0 %v1176_v49 }
 0x20f   : > { %1178 = vmatprep.subr.bf16.mxu0 %v1439_v40 }
 0x211   : > { %v1268_v62 = vpop.eup %1267 }
 0x212   : > { %v1270_v63 = vpop.eup %1269  ;;  %v575_v0 = vsel %vm559_vm6, %v1268_v62, 0.0  ;;  %1180 = vmatpush3.bf16.msra.mxu0 %v1179_v56 }
 0x213   : > { %v576_v1 = vsel %vm559_vm6, %v1270_v63, 0.0  ;;  %1181 = vmatprep.subr.bf16.mxu0 %v1439_v40 }
 0x214   : > { %v577_v2 = vadd.f32 %v576_v1, %v575_v0 }
 0x216   : > { %v578_v3 = vrot.slane %v577_v2, 4  ;;  %1183 = vmatpush3.bf16.msra.mxu0 %v1182_v59 }
 0x217   : > { %1184 = vmatprep.subr.bf16.mxu0 %v1439_v40 }
 0x218   : > { %v579_v4 = vadd.f32 %v578_v3, %v577_v2 }
 0x21a   : > { %v580_v5 = vrot.slane %v579_v4, 2  ;;  %1186 = vmatpush3.bf16.msra.mxu0 %v1185_v23 }
 0x21b   : > { %1187 = vmatprep.subr.bf16.mxu0 %v1439_v40 }
 0x21c   : > { %v581_v6 = vadd.f32 %v580_v5, %v579_v4 }
 0x21e   : > { %v582_v7 = vrot.slane %v581_v6, 1  ;;  %1189 = vmatpush3.bf16.msra.mxu0 %v1188_v27 }
 0x220   : > { %v583_v8 = vadd.f32 %v582_v7, %v581_v6 }
 0x222   : > { %1271 = vrcp.f32 %v583_v8 }
 0x22c   : > { %v1272_v9 = vpop.eup %1271 }
 0x22d   : > { %v586_v10 = vmul.f32 %v1272_v9, %v1270_v63  ;;  %v585_v11 = vmul.f32 %v1272_v9, %v1268_v62  ;;  %v809_v62 = vshrl.u32 %v806_v60, 7  ;;  %v812_v63 = vadd.s32 4294967288, %v807_v61 }
 0x22f   : > { %594 = vperm.xlu1 %1262, %v586_v10   ;;  %589 = vperm.xlu0 %1261, %v585_v11   ;;  %v815_v0 = vsub.s32 %v812_v63, %v809_v62  ;;  %v810_v1 = vsub.s32 %v807_v61, %v809_v62 }
 0x2ae   : > { %v595_v2 = vpop.permute.xlu1 %594  ;;  %v590_v3 = vpop.permute.xlu0 %589 }
 0x2af   : > { %v599_v4 = vmul.f32 %v595_v2, %v1641_v52  ;;  %v600_v5 = vmul.f32 %v595_v2, %v1636_v51  ;;  %v816_v6 = vrot.slane %v595_v2, %v815_v0  ;;  %v597_v7 = vmul.f32 %v590_v3, %v1633_v50 }
 0x2b0   : > { %v598_v8 = vmul.f32 %v590_v3, %v1629_v26  ;;  %v811_v9 = vrot.slane %v590_v3, %v810_v1 }
 0x2b1   : > { %v601_v10 = vadd.f32 %v599_v4, %v597_v7 }
 0x2b2   : > { %v608_v11 = vadd.f32 %v600_v5, %v598_v8  ;;  %v818_v12 = vsel %vm817_vm7, %v816_v6, %v811_v9 }
 0x2b3   : > { %v602_v13 = vrot.slane %v601_v10, 4  ;;  %821 = vst.msk [vmem:[%s387_s12] sm:$0x1] %vm820_vm8, %v818_v12 }
 0x2b4   : > { %v609_v14 = vrot.slane %v608_v11, 4 }
 0x2b5   : > { %v603_v15 = vadd.f32 %v602_v13, %v601_v10 }
 0x2b6   : > { %v610_v16 = vadd.f32 %v609_v14, %v608_v11 }
 0x2b7   : > { %v604_v52 = vrot.slane %v603_v15, 2 }
 0x2b8   : > { %v611_v17 = vrot.slane %v610_v16, 2 }
 0x2b9   : > { %v605_v51 = vadd.f32 %v604_v52, %v603_v15 }
 0x2ba   : > { %v612_v18 = vadd.f32 %v611_v17, %v610_v16 }
 0x2bb   : > { %v606_v19 = vrot.slane %v605_v51, 1 }
 0x2bc   : > { %v613_v50 = vrot.slane %v612_v18, 1 }
 0x2bd   : > { %v607_v20 = vadd.f32 %v606_v19, %v605_v51 }
 0x2be   : > { %v614_v26 = vadd.f32 %v613_v50, %v612_v18 }
 0x2c0   : > { %712 = vmatprep.mubr.f32.mxu1 %v614_v26 }
 0x2c1   : > { %713 = vmatmul.mubr.f32.vlgmr.msra.gmra.mrb[0].mxu1 %v607_v20 }
 0x394   : > { %v1047_v28 = vpop.f32.mrb[0].mxu1 }
 0x395   : > { %v1048_v30 = vpop.f32.mrb[1].mxu1 }
 0x396   : > { %v1049_v31 = vadd.f32 %v1048_v30, %v1047_v28 }
 0x398   : > { %v715_v32 = vadd.f32 %v1049_v31, %v647_v29 }
 0x39a   : > { %v718_v33 = vmax.f32 %v715_v32, 0.0 }
 0x39c   : > { %1100 = vmatmul.mubr.f32.vlgmr.msra.gmra.mrb[4].mxu0 %v718_v33 }
 0x39d   : > { %1342 = shalt.err (!%p1339_p11)
}
 0x39e   : > { %s1343_s12 = scalar_lea.hbm %s1738_s13, 16  ;;  %s1347_s20 = scalar_lea.hbm %s1821_s9, 32 }
 0x39f   : > { %p1344_p13 = scmp.ne.s32.totalorder %s1738_s13, %s1343_s12  ;;  %p1348_p6 = scmp.lt.u32.totalorder %s1738_s13, %s1821_s9 }
 0x3a0   : > { %p1349_p9 = scmp.lt.u32.totalorder %s1347_s20, %s1343_s12  ;;  %p1351_p12 = scmp.lt.u32.totalorder %s1343_s12, %s1738_s13 }
 0x3a1   : > { %p1345_p5 = pnand %p1344_p13, %p1841_p1 }
 0x3a2   : > { %p1350_p10 = por %p1349_p9, %p1348_p6 }
 0x3a3   : > { %p1346_p0 = pneg %p1345_p5 }
 0x3a4   : > { %p1352_p2 = por %p1351_p12, %p1350_p10 }
 0x3a6   : > { %p1353_p3 = pnand %p1352_p2, %p1346_p0 }
 0x3a8   : > { %1356 = shalt.err (!%p1353_p3)
}
 0x3a9   : > { %1198 = dma.vmem_to_hbm [thread:$0]  (%p1841_p1), %s842_s14, 16, %s1738_s13, %s825_s19   ;;  %v735_v53 = vld [vmem:[%s1820_s8] sm:$0x1]  ;;  %vm822_vm10 = vcmask 24576  }
 0x3aa   : > { %s393_s27 = scalar_lea.vmem [#allocation9], %s1706_s11  ;;  %s1769_s17 = scalar_lea.hbm %s1822_s10, %s972_s23 }
 0x3ab   : > { %s854_s30 = sshll.u32 %s393_s27, 4  ;;  %s829_s13 = scalar_lea.sflag [#allocation10], %s1706_s11  ;;  %s1771_s30 = int_to_ptr.vmem [resolvable:$true] %s854_s30 }
 0x3ac   : > { %s1357_s14 = scalar_lea.vmem %s1771_s30, 16  ;;  %s1442_s19 = smov [#allocation9]  }
 0x3ad   : > { %p1358_p4 = scmp.ne.s32.totalorder %s1771_s30, %s1357_s14  ;;  %s1361_s20 = sshll.u32 %s1442_s19, 4  ;;  %s1362_s20 = int_to_ptr.vmem [resolvable:$false] %s1361_s20 }
 0x3ae   : > { %s1363_s4 = scalar_lea.vmem %s1362_s20, 32  ;;  %p1364_p11 = scmp.lt.s32.totalorder %s1771_s30, %s1362_s20 }
 0x3af   : > { %p1359_p7 = pnand %p1358_p4, %p1841_p1  ;;  %p1365_p13 = scmp.lt.s32.totalorder %s1363_s4, %s1357_s14 }
 0x3b1   : > { %p1360_p8 = pneg %p1359_p7  ;;  %p1366_p5 = por %p1365_p13, %p1364_p11 }
 0x3b3   : > { %p1367_p0 = pnand %p1366_p5, %p1360_p8 }
 0x46f   : > { %v802_v34 = vpop.f32.mrb[4].mxu0 }
 0x470   : > { %v803_v35 = vadd.f32 %v802_v34, %v735_v53  ;;  %v1101_v36 = vpop.f32.mrb[5].mxu0 }
 0x472   : > { %823 = vst.msk [vmem:[%s393_s27] sm:$0x1] %vm822_vm10, %v803_v35 }
 0x473   : > { %1370 = shalt.err (!%p1367_p0)
}
 0x474   : > { %s1371_s11 = scalar_lea.hbm %s1769_s17, 16  ;;  %s1375_s29 = scalar_lea.hbm %s1822_s10, 32 }
 0x475   : > { %p1372_p6 = scmp.ne.s32.totalorder %s1769_s17, %s1371_s11  ;;  %p1376_p12 = scmp.lt.u32.totalorder %s1769_s17, %s1822_s10 }
 0x476   : > { %p1377_p2 = scmp.lt.u32.totalorder %s1375_s29, %s1371_s11  ;;  %p1379_p4 = scmp.lt.u32.totalorder %s1371_s11, %s1769_s17 }
 0x477   : > { %p1373_p9 = pnand %p1372_p6, %p1841_p1 }
 0x478   : > { %p1378_p3 = por %p1377_p2, %p1376_p12 }
 0x479   : > { %p1374_p10 = pneg %p1373_p9 }
 0x47a   : > { %p1380_p7 = por %p1379_p4, %p1378_p3 }
 0x47c   : > { %p1381_p8 = pnand %p1380_p7, %p1374_p10 }
 0x47e   : > { %1384 = shalt.err (!%p1381_p8)
}
 0x47f   : > { %1199 = dma.vmem_to_hbm [thread:$0]  (%p1841_p1), %s1771_s30, 16, %s1769_s17, %s829_s13  }
 0x480 PF: > { %p1220_p11 = scmp.ge.s32.totalorder %s1431_s18, 2  ;;  %s866_s27 = sand.u32 1, %s1419_s15  }
 0x481   : > { %p1842_p13 = scmp.ne.s32.totalorder %s1833_s25, 0  ;;  %s867_s12 = scalar_lea.sflag [#allocation5], %s866_s27 }
 0x483   : > { %p1210_p5 = pnand %p1220_p11, %p1842_p13 }
 0x485   : > { %1410 = dma.done.wait (!%p1210_p5), %s867_s12, 16  }
 0x486   : > { %1412 = vsyncadd (!%p1210_p5), %s867_s12, 4294967280  ;;  %s875_s28 = scalar_lea.sflag [#allocation10], %s866_s27 }
 0x487   : > { %1414 = dma.done.wait (!%p1210_p5), %s875_s28, 16  }
 0x488   : > { %1416 = vsyncadd (!%p1210_p5), %s875_s28, 4294967280  ;;  %s1843_s18 = sld [smem:[#allocation16_spill]]  ;;  %s1844_s24 = sld [smem:[#allocation15_spill]] }
 0x489   : > { %s1845_s17 = sld [smem:[#allocation17_spill]]  ;;  %s1846_s15 = smov %s1423_s16 }
 0x48e   : > { %p28_p1 = scmp.ge.s32.totalorder %s1843_s18, 4   ;;  %s1847_s16 = smov %s1844_s24 }
 0x490   :  { %30 = sbr.rel (!%p28_p1) target bundleno = 10 (0xa), region = 117 }
 0x497   :  { %879 = vsyncpa [#allocation4], 1 }
 0x498   :  { %881 = vsyncpa [#allocation4 + $0x1], 1 }
 0x499   :  { %882 = vsyncpa [#allocation7], 1 }
 0x49a   :  { %883 = vsyncpa [#allocation5], 1 }
 0x49b   :  { %885 = vsyncpa [#allocation5 + $0x1], 1 }
 0x49c   :  { %886 = vsyncpa [#allocation10], 1 }
 0x49d   :  { %888 = vsyncpa [#allocation10 + $0x1], 1 }

</bundles_post_ra>
